<compile_context>
chip_gen: v6e
topology: v6e:2x2x1
jax: 0.10.0
libtpu: 0.0.40
codegen_flags: <defaults>
</compile_context>

<pallas_src>
import jax
import jax.numpy as jnp
from jax.experimental import pallas as pl
from jax.experimental.pallas import tpu as pltpu


def _round_up(v, m):
    return (v + m - 1) // m * m


def _lora_linear_kernel(x_ref, w_ref, xa_ref, bT_ref, bias_ref, o_ref, acc_ref):
    """Grid point (i, j, k): accumulate one K-slab of the frozen matmul.

    x_ref    [tm, tk]   activations (compute dtype)
    w_ref    [tk, tn]   frozen weight, pre-transposed to [in, out]
    xa_ref   [tm, r_p]  (x @ A.T) * (alpha/rank), precomputed in the wrapper
    bT_ref   [r_p, tn]  LoRA B, pre-transposed to [rank, out]
    bias_ref [1,  tn]   b_orig + lora_bias (f32)
    o_ref    [tm, tn]   output tile
    acc_ref  [tm, tn]   f32 accumulator (scratch, persists across k)
    """
    k = pl.program_id(2)

    @pl.when(k == 0)
    def _():
        acc_ref[...] = jnp.zeros_like(acc_ref)

    # Natural [tm,tk] @ [tk,tn] contraction -> no RHS relayout before the MXU.
    acc_ref[...] += jnp.dot(x_ref[...], w_ref[...],
                            preferred_element_type=jnp.float32)

    @pl.when(k == pl.num_programs(2) - 1)
    def _():
        lora = jnp.dot(xa_ref[...], bT_ref[...],
                       preferred_element_type=jnp.float32)
        o_ref[...] = (acc_ref[...] + lora + bias_ref[...]).astype(o_ref.dtype)


def prepare_lora_params(w_orig, b_orig, lora_a, lora_b, lora_bias, *,
                        alpha=1.0, compute_dtype=jnp.bfloat16,
                        tn=512, tk=1024, megacore_split_n=True):
    """One-time (cacheable) preprocessing of the frozen / LoRA parameters.

    w_orig:    [out, in]   frozen nn.Linear weight (row-major, not transposed)
    b_orig:    [out] or None
    lora_a:    [rank, in]
    lora_b:    [out, rank]
    lora_bias: [out] or None
    Returns a dict consumed by lora_linear(); call once, reuse across calls.
    """
    N, K = w_orig.shape
    rank, K2 = lora_a.shape
    assert K == K2, "in_features mismatch between W and lora_A"
    assert lora_b.shape == (N, rank), "lora_B shape mismatch"

    # ---- Tile selection along N, K (lane = 128). ----
    n_min = _round_up(N, 128)
    k_min = _round_up(K, 128)
    tn = min(tn, n_min)
    # v7x has 2 TensorCores; make the 'parallel' n-axis >= 2 blocks when cheap.
    if megacore_split_n and n_min // tn < 2 and tn >= 256:
        tn = _round_up(tn // 2, 128)
    tk = min(tk, k_min)
    n_p = _round_up(N, tn)
    k_p = _round_up(K, tk)
    r_p = _round_up(max(rank, 128), 128)   # lane-dense LoRA intermediate

    # ---- Pre-transposed, padded, compute-dtype weights (zero padding: exact) ----
    w_t = jnp.pad(w_orig.astype(compute_dtype).T, ((0, k_p - K), (0, n_p - N)))
    b_t = jnp.pad(lora_b.astype(compute_dtype).T, ((0, r_p - rank), (0, n_p - N)))
    a_t = lora_a.astype(jnp.float32).T            # [K, rank] for the wrapper GEMM

    # Fused additive bias (b_orig + lora_bias), kept in f32.
    bias = jnp.zeros((N,), jnp.float32)
    if b_orig is not None:
        bias = bias + b_orig.astype(jnp.float32)
    if lora_bias is not None:
        bias = bias + lora_bias.astype(jnp.float32)
    bias = jnp.pad(bias, (0, n_p - N)).reshape(1, n_p)

    return dict(w_t=w_t, b_t=b_t, a_t=a_t, bias=bias,
                N=N, K=K, rank=rank, n_p=n_p, k_p=k_p, r_p=r_p,
                tn=tn, tk=tk, scale=float(alpha) / float(rank),
                compute_dtype=compute_dtype)


def lora_linear(x, params, *, tm=512, w_buffers=2):
    """LoRALinear forward: y = x @ W.T + b + (x @ A.T @ B.T) * alpha/rank + lb.

    x: [M, in].  params: output of prepare_lora_params (cached).
    w_buffers: pipeline depth of the W stream (sweep 3 on v5e's slower HBM).
    """
    M, K = x.shape
    assert K == params["K"], "in_features mismatch"
    N = params["N"]
    n_p, k_p, r_p = params["n_p"], params["k_p"], params["r_p"]
    tn, tk = params["tn"], params["tk"]
    cdt = params["compute_dtype"]
    out_dtype = x.dtype

    # ---- Per-call activation preprocessing only (weights already cached). ----
    xa = (x.astype(jnp.float32) @ params["a_t"]) * params["scale"]  # [M, rank]

    tm = min(tm, _round_up(M, 8))
    m_p = _round_up(M, tm)

    x_p = jnp.pad(x.astype(cdt), ((0, m_p - M), (0, k_p - K)))
    xa_p = jnp.pad(xa.astype(cdt), ((0, m_p - M), (0, r_p - params["rank"])))

    grid = (m_p // tm, n_p // tn, k_p // tk)

    # Scoped-VMEM budget: buffered tiles + f32 accumulator, 2x headroom,
    # floored at 32 MiB, capped at 48 MiB (v7x physical VMEM is 64 MiB/TC).
    cb = jnp.dtype(cdt).itemsize
    ob = jnp.dtype(out_dtype).itemsize
    est = (max(2, w_buffers) * tk * tn * cb      # W tiles
           + 2 * tm * tk * cb                    # x tiles
           + 2 * tm * r_p * cb                   # xa tiles
           + 2 * r_p * tn * cb                   # B tiles
           + 2 * 8 * tn * 4                      # bias row (sublane-padded)
           + 2 * tm * tn * ob                    # output tiles
           + tm * tn * 4)                        # f32 accumulator
    vmem_limit = int(min(max(2 * est, 32 * 1024 * 1024), 48 * 1024 * 1024))

    if w_buffers != 2:
        w_spec = pl.BlockSpec((tk, tn), lambda i, j, k: (k, j),
                              pipeline_mode=pl.Buffered(w_buffers))
    else:
        w_spec = pl.BlockSpec((tk, tn), lambda i, j, k: (k, j))

    out = pl.pallas_call(
        _lora_linear_kernel,
        out_shape=jax.ShapeDtypeStruct((m_p, n_p), out_dtype),
        grid_spec=pltpu.PrefetchScalarGridSpec(
            num_scalar_prefetch=0,
            grid=grid,
            in_specs=[
                pl.BlockSpec((tm, tk), lambda i, j, k: (i, k)),     # x tile
                w_spec,                                             # W^T [in,out]
                pl.BlockSpec((tm, r_p), lambda i, j, k: (i, 0)),    # (x A^T)*scale
                pl.BlockSpec((r_p, tn), lambda i, j, k: (0, j)),    # B^T [rank,out]
                pl.BlockSpec((1, tn), lambda i, j, k: (0, j)),      # fused bias
            ],
            out_specs=pl.BlockSpec((tm, tn), lambda i, j, k: (i, j)),
            scratch_shapes=[pltpu.VMEM((tm, tn), jnp.float32)],
        ),
        compiler_params=pltpu.CompilerParams(
            dimension_semantics=("parallel", "parallel", "arbitrary"),
            vmem_limit_bytes=vmem_limit,
        ),
    )(x_p, params["w_t"], xa_p, params["b_t"], params["bias"])

    return out[:M, :N]


if __name__ == "__main__":
    # Small shapes consistent with nn.Linear(in_features=32, out_features=64)
    # wrapped by LoRALinear(rank=4, alpha=1.0, dropout=0.0).
    batch, in_features, out_features, rank = 16, 32, 64, 4
    alpha = 1.0

    key = jax.random.PRNGKey(0)
    kx, kw, kb, ka, kbl, kbias = jax.random.split(key, 6)

    x = jax.random.normal(kx, (batch, in_features), dtype=jnp.float32)

    # Deterministic synthetic parameters (PyTorch init would leave lora_B and
    # biases at zero; nonzero values exercise the LoRA path).
    w_orig = jax.random.normal(kw, (out_features, in_features), jnp.float32) * 0.1
    b_orig = jax.random.normal(kb, (out_features,), jnp.float32) * 0.1
    lora_a = jax.random.normal(ka, (rank, in_features), jnp.float32) * (1.0 / rank)
    lora_b = jax.random.normal(kbl, (out_features, rank), jnp.float32) * 0.1
    lora_bias = jax.random.normal(kbias, (out_features,), jnp.float32) * 0.1

    # Pure-JAX reference of the exact PyTorch forward semantics.
    orig_ref = x @ w_orig.T + b_orig
    lora_ref = (x @ lora_a.T @ lora_b.T) * (alpha / rank) + lora_bias
    y_ref = orig_ref + lora_ref

    # Exact f32 path (weights prepared once, reused across calls).
    params_f32 = prepare_lora_params(w_orig, b_orig, lora_a, lora_b, lora_bias,
                                     alpha=alpha, compute_dtype=jnp.float32)
    y = lora_linear(x, params_f32)
    y = jax.block_until_ready(y)
    assert y.shape == (batch, out_features)
    assert jnp.allclose(y, y_ref, atol=1e-4, rtol=1e-4), "f32 mismatch vs reference"

    # Default bf16 compute path (f32 accumulation) — MXU peak on v5e/v6e/v7x.
    params_bf16 = prepare_lora_params(w_orig, b_orig, lora_a, lora_b, lora_bias,
                                      alpha=alpha)   # compute_dtype=bf16 default
    y_bf16 = lora_linear(x, params_bf16)
    y_bf16 = jax.block_until_ready(y_bf16)
    assert jnp.allclose(y_bf16, y_ref, atol=5e-2, rtol=5e-2), "bf16 mismatch vs reference"

    print("KERNEL_OK")
</pallas_src>

<mosaic_0001>
module attributes {stable_mosaic.version = 11 : i64} {
  func.func @_lora_linear_kernel(%arg0: i32, %arg1: i32, %arg2: i32, %arg3: memref<16x128xf32, #tpu.memory_space<vmem>>, %arg4: memref<128x128xf32, #tpu.memory_space<vmem>>, %arg5: memref<16x128xf32, #tpu.memory_space<vmem>>, %arg6: memref<128x128xf32, #tpu.memory_space<vmem>>, %arg7: memref<1x128xf32, #tpu.memory_space<vmem>>, %arg8: memref<16x128xf32, #tpu.memory_space<vmem>>, %arg9: memref<16x128xf32, #tpu.memory_space<vmem>>) attributes {dimension_semantics = [#tpu.dimension_semantics<parallel>, #tpu.dimension_semantics<parallel>, #tpu.dimension_semantics<arbitrary>], iteration_bounds = array<i64: 1, 1, 1>, scalar_prefetch = 0 : i64, scratch_operands = 1 : i64, tpu.core_type = #tpu.core_type<tc>, window_params = [{transform_indices = @transform_0, window_bounds = array<i64: 16, 128>}, {transform_indices = @transform_1, window_bounds = array<i64: 128, 128>}, {transform_indices = @transform_2, window_bounds = array<i64: 16, 128>}, {transform_indices = @transform_3, window_bounds = array<i64: 128, 128>}, {transform_indices = @transform_4, window_bounds = array<i64: 1, 128>}, {transform_indices = @transform_5, window_bounds = array<i64: 16, 128>}]} {
    %c0_i32 = arith.constant 0 : i32
    %0 = arith.cmpi eq, %arg2, %c0_i32 : i32
    %1 = arith.extui %0 : i1 to i32
    %c0_i32_0 = arith.constant 0 : i32
    %2 = arith.cmpi ne, %1, %c0_i32_0 : i32
    scf.if %2 {
      %cst_10 = arith.constant 0.000000e+00 : f32
      %12 = vector.broadcast %cst_10 : f32 to vector<16x128xf32>
      %c0_11 = arith.constant 0 : index
      %c0_12 = arith.constant 0 : index
      %13 = vector.load %arg9[%c0_11, %c0_12] : memref<16x128xf32, #tpu.memory_space<vmem>>, vector<16x128xf32>
      tpu.vector_store %arg9[%c0_11, %c0_12], %12 {strides = array<i32>} : memref<16x128xf32, #tpu.memory_space<vmem>>, vector<16x128xf32>,
    } else {
    }
    %c0 = arith.constant 0 : index
    %c0_1 = arith.constant 0 : index
    %3 = vector.load %arg9[%c0, %c0_1] : memref<16x128xf32, #tpu.memory_space<vmem>>, vector<16x128xf32>
    %c0_2 = arith.constant 0 : index
    %c0_3 = arith.constant 0 : index
    %4 = vector.load %arg3[%c0_2, %c0_3] : memref<16x128xf32, #tpu.memory_space<vmem>>, vector<16x128xf32>
    %c0_4 = arith.constant 0 : index
    %c0_5 = arith.constant 0 : index
    %5 = vector.load %arg4[%c0_4, %c0_5] : memref<128x128xf32, #tpu.memory_space<vmem>>, vector<128x128xf32>
    %cst = arith.constant dense<0.000000e+00> : vector<16x128xf32>
    %6 = tpu.matmul %4, %5, %cst {dimension_numbers = #tpu.dot_dimension_numbers<[1], [0], [0], [1], [0, 0, 1, 1], [], []>} : vector<16x128xf32>, vector<128x128xf32>, vector<16x128xf32> -> vector<16x128xf32>
    %7 = arith.addf %3, %6 : vector<16x128xf32>
    %c0_6 = arith.constant 0 : index
    %c0_7 = arith.constant 0 : index
    %8 = vector.load %arg9[%c0_6, %c0_7] : memref<16x128xf32, #tpu.memory_space<vmem>>, vector<16x128xf32>
    tpu.vector_store %arg9[%c0_6, %c0_7], %7 {strides = array<i32>} : memref<16x128xf32, #tpu.memory_space<vmem>>, vector<16x128xf32>,
    %c0_i32_8 = arith.constant 0 : i32
    %9 = arith.cmpi eq, %arg2, %c0_i32_8 : i32
    %10 = arith.extui %9 : i1 to i32
    %c0_i32_9 = arith.constant 0 : i32
    %11 = arith.cmpi ne, %10, %c0_i32_9 : i32
    scf.if %11 {
      %c0_10 = arith.constant 0 : index
      %c0_11 = arith.constant 0 : index
      %12 = vector.load %arg5[%c0_10, %c0_11] : memref<16x128xf32, #tpu.memory_space<vmem>>, vector<16x128xf32>
      %c0_12 = arith.constant 0 : index
      %c0_13 = arith.constant 0 : index
      %13 = vector.load %arg6[%c0_12, %c0_13] : memref<128x128xf32, #tpu.memory_space<vmem>>, vector<128x128xf32>
      %cst_14 = arith.constant dense<0.000000e+00> : vector<16x128xf32>
      %14 = tpu.matmul %12, %13, %cst_14 {dimension_numbers = #tpu.dot_dimension_numbers<[1], [0], [0], [1], [0, 0, 1, 1], [], []>} : vector<16x128xf32>, vector<128x128xf32>, vector<16x128xf32> -> vector<16x128xf32>
      %c0_15 = arith.constant 0 : index
      %c0_16 = arith.constant 0 : index
      %15 = vector.load %arg9[%c0_15, %c0_16] : memref<16x128xf32, #tpu.memory_space<vmem>>, vector<16x128xf32>
      %16 = arith.addf %15, %14 : vector<16x128xf32>
      %c0_17 = arith.constant 0 : index
      %c0_18 = arith.constant 0 : index
      %17 = vector.load %arg7[%c0_17, %c0_18] : memref<1x128xf32, #tpu.memory_space<vmem>>, vector<1x128xf32>
      %18 = vector.broadcast %17 : vector<1x128xf32> to vector<16x128xf32>
      %19 = arith.addf %16, %18 : vector<16x128xf32>
      %c0_19 = arith.constant 0 : index
      %c0_20 = arith.constant 0 : index
      %20 = vector.load %arg8[%c0_19, %c0_20] : memref<16x128xf32, #tpu.memory_space<vmem>>, vector<16x128xf32>
      tpu.vector_store %arg8[%c0_19, %c0_20], %19 {strides = array<i32>} : memref<16x128xf32, #tpu.memory_space<vmem>>, vector<16x128xf32>,
    } else {
    }
    return
  }
  func.func @transform_0(%arg0: i32, %arg1: i32, %arg2: i32) -> (i32, i32) {
    %c0_i32 = arith.constant 0 : i32
    return %arg0, %arg2 : i32, i32
  }
  func.func @transform_1(%arg0: i32, %arg1: i32, %arg2: i32) -> (i32, i32) {
    %c0_i32 = arith.constant 0 : i32
    return %arg2, %arg1 : i32, i32
  }
  func.func @transform_2(%arg0: i32, %arg1: i32, %arg2: i32) -> (i32, i32) {
    %c0_i32 = arith.constant 0 : i32
    %c0_i32_0 = arith.constant 0 : i32
    return %arg0, %c0_i32 : i32, i32
  }
  func.func @transform_3(%arg0: i32, %arg1: i32, %arg2: i32) -> (i32, i32) {
    %c0_i32 = arith.constant 0 : i32
    %c0_i32_0 = arith.constant 0 : i32
    return %c0_i32, %arg1 : i32, i32
  }
  func.func @transform_4(%arg0: i32, %arg1: i32, %arg2: i32) -> (i32, i32) {
    %c0_i32 = arith.constant 0 : i32
    %c0_i32_0 = arith.constant 0 : i32
    return %c0_i32, %arg1 : i32, i32
  }
  func.func @transform_5(%arg0: i32, %arg1: i32, %arg2: i32) -> (i32, i32) {
    %c0_i32 = arith.constant 0 : i32
    return %arg0, %arg1 : i32, i32
  }
}

</mosaic_0001>

<bundles_post_ra>
// kernel: tpu_custom_call.1
= control target key start
LH: loop header
LB: loop body
LE: loop exit
PB: predicated region body
PF: predicated region fallthrough
CT: control target
= control target key end

     0   :  { %10 = vsyncpa [#allocation4], 0  ;;  %s603_s0 = inlined_call_operand.hbm [shape: f32[16,128], index: 0, kind: input, shape index: {}]   ;;  %s604_s1 = inlined_call_operand.hbm [shape: f32[128,128], index: 1, kind: input, shape index: {}]   ;;  %s605_s2 = inlined_call_operand.hbm [shape: f32[16,128], index: 2, kind: input, shape index: {}]   ;;  %s606_s3 = inlined_call_operand.hbm [shape: f32[128,128], index: 3, kind: input, shape index: {}]   ;;  %s607_s4 = inlined_call_operand.vmem [shape: f32[1,128], index: 4, kind: input, shape index: {}]   ;;  %s608_s5 = inlined_call_operand.hbm [shape: f32[16,128], index: 5, kind: output, shape index: {}]  }
   0x1   :  { %11 = vsyncpa [#allocation7], 0 }
   0x2   :  { %12 = vsyncpa [#allocation10], 0 }
   0x3   :  { %13 = vsyncpa [#allocation5], 0  ;;  %s533_s18 = smov [#allocation6]   ;;  %s534_s20 = smov [#allocation3]  }
   0x4   :  { %s31_s19 = sshll.u32 %s533_s18, 4  ;;  %s19_s21 = sshll.u32 %s534_s20, 4  ;;  %s32_s19 = int_to_ptr.vmem [resolvable:$true] %s31_s19  ;;  %s20_s21 = int_to_ptr.vmem [resolvable:$true] %s19_s21 }
   0x5   :  { %s433_s22 = scalar_lea.vmem %s32_s19, 2048  ;;  %p438_p1 = scmp.lt.s32.totalorder %s32_s19, %s32_s19 }
   0x6   :  { %p434_p0 = scmp.ne.s32.totalorder %s32_s19, %s433_s22  ;;  %p439_p2 = scmp.lt.s32.totalorder %s433_s22, %s433_s22 }
   0x8   :  { %p440_p3 = por %p439_p2, %p438_p1 }
   0xa   :  { %p441_p4 = pnand %p440_p3, %p434_p0 }
   0xc   :  { %444 = shalt.err (!%p441_p4)
}
   0xd   :  { %s535_s23 = smov 128   ;;  %s536_s24 = smov 8  }
   0xe   :  { %37 = dma.hbm_to_vmem [thread:$0]  %s604_s1, 2048, %s32_s19, [#allocation7], %s535_s23, %s535_s23, %s536_s24  }
   0xf   :  { %s453_s27 = scalar_lea.vmem %s20_s21, 256  ;;  %p458_p6 = scmp.lt.s32.totalorder %s20_s21, %s20_s21 }
  0x10   :  { %p454_p5 = scmp.ne.s32.totalorder %s20_s21, %s453_s27  ;;  %p459_p7 = scmp.lt.s32.totalorder %s453_s27, %s453_s27 }
  0x12   :  { %p460_p8 = por %p459_p7, %p458_p6 }
  0x14   :  { %p461_p9 = pnand %p460_p8, %p454_p5 }
  0x16   :  { %464 = shalt.err (!%p461_p9)
}
  0x17   :  { %25 = dma.hbm_to_vmem [thread:$0]  %s603_s0, 256, %s20_s21, [#allocation4], %s535_s23, %s535_s23, %s536_s24  }
  0x18   :  { %s537_s30 = smov [#allocation8]   ;;  %s538_s7 = smov [#allocation9]  }
  0x19   :  { %s43_s6 = sshll.u32 %s537_s30, 4  ;;  %s55_s8 = sshll.u32 %s538_s7, 4  ;;  %s44_s6 = int_to_ptr.vmem [resolvable:$true] %s43_s6  ;;  %s56_s8 = int_to_ptr.vmem [resolvable:$true] %s55_s8 }
  0x1a   :  { %s473_s1 = scalar_lea.vmem %s44_s6, 256  ;;  %p478_p11 = scmp.lt.s32.totalorder %s44_s6, %s44_s6 }
  0x1b   :  { %p474_p10 = scmp.ne.s32.totalorder %s44_s6, %s473_s1  ;;  %p479_p12 = scmp.lt.s32.totalorder %s473_s1, %s473_s1 }
  0x1d   :  { %p480_p13 = por %p479_p12, %p478_p11 }
  0x1f   :  { %p481_p0 = pnand %p480_p13, %p474_p10 }
  0x21   :  { %484 = shalt.err (!%p481_p0)
}
  0x22   :  { %49 = dma.hbm_to_vmem [thread:$0]  %s605_s2, 256, %s44_s6, [#allocation7], %s535_s23, %s535_s23, %s536_s24  }
  0x23   :  { %s493_s0 = scalar_lea.vmem %s56_s8, 2048  ;;  %p498_p2 = scmp.lt.s32.totalorder %s56_s8, %s56_s8 }
  0x24   :  { %p494_p1 = scmp.ne.s32.totalorder %s56_s8, %s493_s0  ;;  %p499_p3 = scmp.lt.s32.totalorder %s493_s0, %s493_s0 }
  0x26   :  { %p500_p4 = por %p499_p3, %p498_p2 }
  0x28   :  { %p501_p5 = pnand %p500_p4, %p494_p1 }
  0x2a   :  { %504 = shalt.err (!%p501_p5)
}
  0x2b   :  { %61 = dma.hbm_to_vmem [thread:$0]  %s606_s3, 2048, %s56_s8, [#allocation10], %s535_s23, %s535_s23, %s536_s24  }
  0x2c   :  { %525 = dma.done.wait [#allocation4], 256  }
  0x2d   :  { %526 = vsyncadd [#allocation4], 4294967040 }
  0x2e   :  { %527 = dma.done.wait [#allocation7], 2304  }
  0x2f   :  { %528 = vsyncadd [#allocation7], 4294964992 }
  0x30   :  { %529 = dma.done.wait [#allocation10], 2048  }
  0x31   :  { %530 = vsyncadd [#allocation10], 4294965248  ;;  %v101_v0 = vld [vmem:[#allocation6 + $0x78] sm:$0xff]  ;;  %v201_v1 = vld [vmem:[#allocation9 + $0x78] sm:$0xff]  ;;  %s539_s13 = smov [#allocation11]  }
  0x32   :  { %v100_v2 = vld [vmem:[#allocation6 + $0x70] sm:$0xff]  ;;  %348 = vmatprep.subr.mxu0 %v101_v0  ;;  %383 = vmatprep.subr.mxu1 %v201_v1  ;;  %v200_v3 = vld [vmem:[#allocation9 + $0x70] sm:$0xff]  ;;  %v99_v4 = vld [vmem:[#allocation6 + $0x68] sm:$0xff]  ;;  %s297_s14 = sshll.u32 %s539_s13, 4  ;;  %s298_s14 = int_to_ptr.vmem [resolvable:$true] %s297_s14 }
  0x33   :  { %349 = vmatpush3.msra.mxu0 %v101_v0  ;;  %384 = vmatpush3.msra.mxu1 %v201_v1  ;;  %v199_v5 = vld [vmem:[#allocation9 + $0x68] sm:$0xff]  ;;  %v98_v6 = vld [vmem:[#allocation6 + $0x60] sm:$0xff]  ;;  %v198_v7 = vld [vmem:[#allocation9 + $0x60] sm:$0xff]  ;;  %s505_s15 = scalar_lea.vmem %s298_s14, 256  ;;  %p510_p7 = scmp.lt.s32.totalorder %s298_s14, %s298_s14 }
  0x34   :  { %350 = vmatprep.subr.mxu0 %v100_v2  ;;  %385 = vmatprep.subr.mxu1 %v200_v3  ;;  %v97_v8 = vld [vmem:[#allocation6 + $0x58] sm:$0xff]  ;;  %v197_v9 = vld [vmem:[#allocation9 + $0x58] sm:$0xff]  ;;  %v96_v10 = vld [vmem:[#allocation6 + $0x50] sm:$0xff]  ;;  %p506_p6 = scmp.ne.s32.totalorder %s298_s14, %s505_s15  ;;  %p511_p8 = scmp.lt.s32.totalorder %s505_s15, %s505_s15 }
  0x35   :  { %351 = vmatpush3.msra.mxu0 %v100_v2  ;;  %386 = vmatpush3.msra.mxu1 %v200_v3  ;;  %v196_v11 = vld [vmem:[#allocation9 + $0x50] sm:$0xff]  ;;  %v95_v12 = vld [vmem:[#allocation6 + $0x48] sm:$0xff]  ;;  %v195_v13 = vld [vmem:[#allocation9 + $0x48] sm:$0xff] }
  0x36   :  { %352 = vmatprep.subr.mxu0 %v99_v4  ;;  %387 = vmatprep.subr.mxu1 %v199_v5  ;;  %v94_v14 = vld [vmem:[#allocation6 + $0x40] sm:$0xff]  ;;  %v194_v15 = vld [vmem:[#allocation9 + $0x40] sm:$0xff]  ;;  %v93_v16 = vld [vmem:[#allocation6 + $0x38] sm:$0xff]  ;;  %p512_p9 = por %p511_p8, %p510_p7 }
  0x37   :  { %353 = vmatpush3.msra.mxu0 %v99_v4  ;;  %388 = vmatpush3.msra.mxu1 %v199_v5  ;;  %v193_v17 = vld [vmem:[#allocation9 + $0x38] sm:$0xff]  ;;  %v92_v18 = vld [vmem:[#allocation6 + $0x30] sm:$0xff]  ;;  %v192_v19 = vld [vmem:[#allocation9 + $0x30] sm:$0xff] }
  0x38   :  { %354 = vmatprep.subr.mxu0 %v98_v6  ;;  %389 = vmatprep.subr.mxu1 %v198_v7  ;;  %v91_v20 = vld [vmem:[#allocation6 + $0x28] sm:$0xff]  ;;  %v191_v21 = vld [vmem:[#allocation9 + $0x28] sm:$0xff]  ;;  %v90_v22 = vld [vmem:[#allocation6 + $0x20] sm:$0xff]  ;;  %p513_p10 = pnand %p512_p9, %p506_p6 }
  0x39   :  { %355 = vmatpush3.msra.mxu0 %v98_v6  ;;  %390 = vmatpush3.msra.mxu1 %v198_v7  ;;  %v190_v23 = vld [vmem:[#allocation9 + $0x20] sm:$0xff]  ;;  %v89_v24 = vld [vmem:[#allocation6 + $0x18] sm:$0xff]  ;;  %v189_v25 = vld [vmem:[#allocation9 + $0x18] sm:$0xff] }
  0x3a   :  { %356 = vmatprep.subr.mxu0 %v97_v8  ;;  %391 = vmatprep.subr.mxu1 %v197_v9  ;;  %v88_v26 = vld [vmem:[#allocation6 + $0x10] sm:$0xff]  ;;  %v188_v27 = vld [vmem:[#allocation9 + $0x10] sm:$0xff]  ;;  %v87_v28 = vld [vmem:[#allocation6 + $0x8] sm:$0xff] }
  0x3b   :  { %357 = vmatpush3.msra.mxu0 %v97_v8  ;;  %392 = vmatpush3.msra.mxu1 %v197_v9  ;;  %v187_v29 = vld [vmem:[#allocation9 + $0x8] sm:$0xff]  ;;  %v86_v30 = vld [vmem:[#allocation6] sm:$0xff]  ;;  %v186_v31 = vld [vmem:[#allocation9] sm:$0xff] }
  0x3c   :  { %358 = vmatprep.subr.mxu0 %v96_v10  ;;  %393 = vmatprep.subr.mxu1 %v196_v11  ;;  %v84_v32 = vld [vmem:[#allocation3] sm:$0xff]  ;;  %v184_v33 = vld [vmem:[#allocation8] sm:$0xff]  ;;  %v85_v34 = vld [vmem:[#allocation3 + $0x8] sm:$0xff] }
  0x3d   :  { %359 = vmatpush3.msra.mxu0 %v96_v10  ;;  %394 = vmatpush3.msra.mxu1 %v196_v11  ;;  %v185_v35 = vld [vmem:[#allocation8 + $0x8] sm:$0xff]  ;;  %v311_v38 = vld [vmem:[%s607_s4] ss:$0 sm:$0xff] }
  0x3e   :  { %360 = vmatprep.subr.mxu0 %v95_v12  ;;  %395 = vmatprep.subr.mxu1 %v195_v13 }
  0x3f   :  { %361 = vmatpush3.msra.mxu0 %v95_v12  ;;  %396 = vmatpush3.msra.mxu1 %v195_v13 }
  0x40   :  { %362 = vmatprep.subr.mxu0 %v94_v14  ;;  %397 = vmatprep.subr.mxu1 %v194_v15 }
  0x41   :  { %363 = vmatpush3.msra.mxu0 %v94_v14  ;;  %398 = vmatpush3.msra.mxu1 %v194_v15 }
  0x42   :  { %364 = vmatprep.subr.mxu0 %v93_v16  ;;  %399 = vmatprep.subr.mxu1 %v193_v17 }
  0x43   :  { %365 = vmatpush3.msra.mxu0 %v93_v16  ;;  %400 = vmatpush3.msra.mxu1 %v193_v17 }
  0x44   :  { %366 = vmatprep.subr.mxu0 %v92_v18  ;;  %401 = vmatprep.subr.mxu1 %v192_v19 }
  0x45   :  { %367 = vmatpush3.msra.mxu0 %v92_v18  ;;  %402 = vmatpush3.msra.mxu1 %v192_v19 }
  0x46   :  { %368 = vmatprep.subr.mxu0 %v91_v20  ;;  %403 = vmatprep.subr.mxu1 %v191_v21 }
  0x47   :  { %369 = vmatpush3.msra.mxu0 %v91_v20  ;;  %404 = vmatpush3.msra.mxu1 %v191_v21 }
  0x48   :  { %370 = vmatprep.subr.mxu0 %v90_v22  ;;  %405 = vmatprep.subr.mxu1 %v190_v23 }
  0x49   :  { %371 = vmatpush3.msra.mxu0 %v90_v22  ;;  %406 = vmatpush3.msra.mxu1 %v190_v23 }
  0x4a   :  { %372 = vmatprep.subr.mxu0 %v89_v24  ;;  %407 = vmatprep.subr.mxu1 %v189_v25 }
  0x4b   :  { %373 = vmatpush3.msra.mxu0 %v89_v24  ;;  %408 = vmatpush3.msra.mxu1 %v189_v25 }
  0x4c   :  { %374 = vmatprep.subr.mxu0 %v88_v26  ;;  %409 = vmatprep.subr.mxu1 %v188_v27 }
  0x4d   :  { %375 = vmatpush3.msra.mxu0 %v88_v26  ;;  %410 = vmatpush3.msra.mxu1 %v188_v27 }
  0x4e   :  { %376 = vmatprep.subr.mxu0 %v87_v28  ;;  %411 = vmatprep.subr.mxu1 %v187_v29 }
  0x4f   :  { %377 = vmatpush3.msra.mxu0 %v87_v28  ;;  %412 = vmatpush3.msra.mxu1 %v187_v29 }
  0x50   :  { %378 = vmatprep.subr.mxu0 %v86_v30  ;;  %413 = vmatprep.subr.mxu1 %v186_v31 }
  0x51   :  { %379 = vmatpush3.msra.mxu0 %v86_v30  ;;  %380 = vmatprep.mubr.f32.mxu0 %v84_v32 }
  0x52   :  { %414 = vmatpush3.msra.mxu1 %v186_v31  ;;  %415 = vmatprep.mubr.f32.mxu1 %v184_v33 }
  0x53   :  { %381 = vmatmul.mubr.f32.vlgmr.msra.gmra.mxu0 %v85_v34  ;;  %416 = vmatmul.mubr.f32.vlgmr.msra.gmra.mxu1 %v185_v35 }
 0x113   :  { %v382_v36 = vpop.f32.mrf.mxu0  ;;  %v417_v37 = vpop.f32.mrf.mxu1 }
 0x114   :  { %v280_v39 = vadd.f32 %v417_v37, %v382_v36 }
 0x115   :  { %v168_v40 = vpop.f32.mrf.mxu0  ;;  %v268_v41 = vpop.f32.mrf.mxu1 }
 0x116   :  { %v289_v42 = vadd.f32 %v311_v38, %v280_v39  ;;  %v279_v43 = vadd.f32 %v268_v41, %v168_v40 }
 0x118   :  { %291 = vst [vmem:[#allocation11 + $0x8] sm:$0xff] %v289_v42  ;;  %v288_v44 = vadd.f32 %v311_v38, %v279_v43 }
 0x11a   :  { %290 = vst [vmem:[#allocation11] sm:$0xff] %v288_v44 }
 0x11b   :  { %516 = shalt.err (!%p513_p10)
}
 0x11c   :  { %303 = dma.vmem_to_hbm [thread:$0]  %s298_s14, 256, %s608_s5, [#allocation5], %s535_s23, %s535_s23, %s536_s24  }
 0x11d   :  { %531 = dma.done.wait [#allocation5], 256  }
 0x11e   :  { %532 = vsyncadd [#allocation5], 4294967040 }
 0x11f   :  { %307 = vsyncpa [#allocation4], 1 }
 0x120   :  { %308 = vsyncpa [#allocation7], 1 }
 0x121   :  { %309 = vsyncpa [#allocation10], 1 }
 0x122   :  { %310 = vsyncpa [#allocation5], 1 }

</bundles_post_ra>
